<compile_context>
chip_gen: v7x
topology: tpu7x:2x2x1
jax: 0.10.0
libtpu: 0.0.40
codegen_flags: <defaults>
</compile_context>

<pallas_src>
import jax
import jax.numpy as jnp
from jax.experimental import pallas as pl
from jax.experimental.pallas import tpu as pltpu

IN_F, H1, H2, OUT_F = 14 * 14, 300, 100, 10          # logical (PyTorch) dims
IN_PAD, H1_PAD, H2_PAD, OUT_PAD = 256, 384, 128, 128  # lane-dense padded dims


def mlp_kernel(x_ref, w1_ref, b1_ref, w2_ref, b2_ref, w3_ref, b3_ref, o_ref):
    # fc1 + relu  (padded cols of w1/b1 are zero -> relu(0) = 0)
    h1 = jnp.dot(x_ref[...], w1_ref[...], preferred_element_type=jnp.float32)
    h1 = jnp.maximum(h1 + b1_ref[...], 0.0)
    # fc2 + relu  (padded rows of w2 are zero -> padded h1 cols are ignored)
    h2 = jnp.dot(h1, w2_ref[...], preferred_element_type=jnp.float32)
    h2 = jnp.maximum(h2 + b2_ref[...], 0.0)
    # fc3 (no activation), padded to 128 lanes (extra logits are exactly 0)
    h3 = jnp.dot(h2, w3_ref[...], preferred_element_type=jnp.float32)
    o_ref[...] = (h3 + b3_ref[...]).astype(o_ref.dtype)


def _round_up(n, m):
    return ((n + m - 1) // m) * m


def _cdiv(a, b):
    return (a + b - 1) // b


def prepare_params(params):
    """One-time padding of params to lane-dense shapes (do NOT call per step)."""
    w1, b1, w2, b2, w3, b3 = params
    w1p = jnp.zeros((IN_PAD, H1_PAD), w1.dtype).at[:IN_F, :H1].set(w1)
    b1p = jnp.zeros((1, H1_PAD), b1.dtype).at[:, :H1].set(b1)
    w2p = jnp.zeros((H1_PAD, H2_PAD), w2.dtype).at[:H1, :H2].set(w2)
    b2p = jnp.zeros((1, H2_PAD), b2.dtype).at[:, :H2].set(b2)
    w3p = jnp.zeros((H2_PAD, OUT_PAD), w3.dtype).at[:H2, :OUT_F].set(w3)
    b3p = jnp.zeros((1, OUT_PAD), b3.dtype).at[:, :OUT_F].set(b3)
    return w1p, b1p, w2p, b2p, w3p, b3p


def net_forward(x, padded_params, *, max_batch_tile=1024):
    """x: [B, 196] f32, padded_params from prepare_params. Returns [B, 10] f32."""
    w1p, b1p, w2p, b2p, w3p, b3p = padded_params
    B = x.shape[0]

    # Adaptive batch tile: at most max_batch_tile rows per step, at least 2
    # grid steps once B >= 16 (so v7x megacore has work on both cores), and
    # minimal padding for non-power-of-two batches.
    min_steps = 2 if B >= 16 else 1
    n_steps = max(_cdiv(B, max_batch_tile), min_steps)
    tb = _round_up(_cdiv(B, n_steps), 8)
    b_pad = tb * _cdiv(B, tb)
    grid = (b_pad // tb,)

    # Pad activations: batch to tile multiple, features 196 -> 256 (zeros hit
    # zero weight rows, so results are unchanged).
    x = jnp.pad(x, ((0, b_pad - B), (0, IN_PAD - IN_F)))

    def batch_spec(shape):
        return pl.BlockSpec(shape, lambda i: (i, 0))     # streams over batch

    def resident_spec(shape):
        return pl.BlockSpec(shape, lambda i: (0, 0))     # VMEM-resident weights

    flops = 2 * b_pad * (IN_PAD * H1_PAD + H1_PAD * H2_PAD + H2_PAD * OUT_PAD)
    bytes_accessed = 4 * (IN_PAD * H1_PAD + H1_PAD * H2_PAD + H2_PAD * OUT_PAD
                          + b_pad * (IN_PAD + OUT_PAD))

    out = pl.pallas_call(
        mlp_kernel,
        out_shape=jax.ShapeDtypeStruct((b_pad, OUT_PAD), jnp.float32),
        grid=grid,
        in_specs=[
            batch_spec((tb, IN_PAD)),
            resident_spec(w1p.shape), resident_spec(b1p.shape),
            resident_spec(w2p.shape), resident_spec(b2p.shape),
            resident_spec(w3p.shape), resident_spec(b3p.shape),
        ],
        out_specs=batch_spec((tb, OUT_PAD)),
        compiler_params=pltpu.CompilerParams(
            dimension_semantics=("parallel",),       # megacore on v7x
            vmem_limit_bytes=32 * 1024 * 1024,       # safe for tb=1024 on v5e too
        ),
        cost_estimate=pl.CostEstimate(
            flops=flops, transcendentals=0, bytes_accessed=bytes_accessed),
    )(x, w1p, b1p, w2p, b2p, w3p, b3p)

    return out[:B, :OUT_F]


def init_params(key):
    # PyTorch nn.Linear default init: U(-1/sqrt(fan_in), 1/sqrt(fan_in))
    def linear(key, fan_in, fan_out):
        kw, kb = jax.random.split(key)
        bound = 1.0 / jnp.sqrt(fan_in)
        w = jax.random.uniform(kw, (fan_in, fan_out), jnp.float32, -bound, bound)
        b = jax.random.uniform(kb, (1, fan_out), jnp.float32, -bound, bound)
        return w, b

    k1, k2, k3 = jax.random.split(key, 3)
    w1, b1 = linear(k1, IN_F, H1)
    w2, b2 = linear(k2, H1, H2)
    w3, b3 = linear(k3, H2, OUT_F)
    return w1, b1, w2, b2, w3, b3


def reference_forward(x, params):
    w1, b1, w2, b2, w3, b3 = params
    h1 = jnp.maximum(x @ w1 + b1, 0.0)
    h2 = jnp.maximum(h1 @ w2 + b2, 0.0)
    return h2 @ w3 + b3


if __name__ == "__main__":
    key = jax.random.PRNGKey(0)
    kx, kp = jax.random.split(key)

    params = init_params(kp)
    padded = prepare_params(params)   # one-time param prep (hoisted)

    # Small batch (single grid step).
    B = 8
    x = jax.random.normal(kx, (B, IN_F), jnp.float32)
    out = jax.block_until_ready(net_forward(x, padded))
    ref = reference_forward(x, params)
    assert out.shape == (B, OUT_F)
    assert jnp.allclose(out, ref, atol=1e-4, rtol=1e-4)

    # Non-tile-multiple batch: exercises adaptive tiling (2 grid steps) and
    # batch padding.
    B2 = 300
    x2 = jax.random.normal(jax.random.PRNGKey(1), (B2, IN_F), jnp.float32)
    out2 = jax.block_until_ready(net_forward(x2, padded))
    ref2 = reference_forward(x2, params)
    assert out2.shape == (B2, OUT_F)
    assert jnp.allclose(out2, ref2, atol=1e-4, rtol=1e-4)

    print("KERNEL_OK")
</pallas_src>

<mosaic_0001>
module attributes {stable_mosaic.version = 11 : i64} {
  func.func @mlp_kernel(%arg0: i32, %arg1: memref<8x256xf32, #tpu.memory_space<vmem>>, %arg2: memref<256x384xf32, #tpu.memory_space<vmem>>, %arg3: memref<1x384xf32, #tpu.memory_space<vmem>>, %arg4: memref<384x128xf32, #tpu.memory_space<vmem>>, %arg5: memref<1x128xf32, #tpu.memory_space<vmem>>, %arg6: memref<128x128xf32, #tpu.memory_space<vmem>>, %arg7: memref<1x128xf32, #tpu.memory_space<vmem>>, %arg8: memref<8x128xf32, #tpu.memory_space<vmem>>) attributes {dimension_semantics = [#tpu.dimension_semantics<parallel>], iteration_bounds = array<i64: 1>, scalar_prefetch = 0 : i64, scratch_operands = 0 : i64, tpu.core_type = #tpu.core_type<tc>, window_params = [{transform_indices = @transform_0, window_bounds = array<i64: 8, 256>}, {pipeline_mode = #tpu.pipeline_mode<synchronous>, transform_indices = @transform_1, window_bounds = array<i64: 256, 384>}, {pipeline_mode = #tpu.pipeline_mode<synchronous>, transform_indices = @transform_2, window_bounds = array<i64: 1, 384>}, {pipeline_mode = #tpu.pipeline_mode<synchronous>, transform_indices = @transform_3, window_bounds = array<i64: 384, 128>}, {pipeline_mode = #tpu.pipeline_mode<synchronous>, transform_indices = @transform_4, window_bounds = array<i64: 1, 128>}, {pipeline_mode = #tpu.pipeline_mode<synchronous>, transform_indices = @transform_5, window_bounds = array<i64: 128, 128>}, {pipeline_mode = #tpu.pipeline_mode<synchronous>, transform_indices = @transform_6, window_bounds = array<i64: 1, 128>}, {transform_indices = @transform_7, window_bounds = array<i64: 8, 128>}]} {
    %c0 = arith.constant 0 : index
    %c0_0 = arith.constant 0 : index
    %0 = vector.load %arg1[%c0, %c0_0] : memref<8x256xf32, #tpu.memory_space<vmem>>, vector<8x256xf32>
    %c0_1 = arith.constant 0 : index
    %c0_2 = arith.constant 0 : index
    %1 = vector.load %arg2[%c0_1, %c0_2] : memref<256x384xf32, #tpu.memory_space<vmem>>, vector<256x384xf32>
    %cst = arith.constant dense<0.000000e+00> : vector<8x384xf32>
    %2 = tpu.matmul %0, %1, %cst {dimension_numbers = #tpu.dot_dimension_numbers<[1], [0], [0], [1], [0, 0, 1, 1], [], []>} : vector<8x256xf32>, vector<256x384xf32>, vector<8x384xf32> -> vector<8x384xf32>
    %c0_3 = arith.constant 0 : index
    %c0_4 = arith.constant 0 : index
    %3 = vector.load %arg3[%c0_3, %c0_4] : memref<1x384xf32, #tpu.memory_space<vmem>>, vector<1x384xf32>
    %4 = vector.broadcast %3 : vector<1x384xf32> to vector<8x384xf32>
    %5 = arith.addf %2, %4 : vector<8x384xf32>
    %cst_5 = arith.constant 0.000000e+00 : f32
    %6 = vector.broadcast %cst_5 : f32 to vector<8x384xf32>
    %7 = arith.maximumf %5, %6 : vector<8x384xf32>
    %c0_6 = arith.constant 0 : index
    %c0_7 = arith.constant 0 : index
    %8 = vector.load %arg4[%c0_6, %c0_7] : memref<384x128xf32, #tpu.memory_space<vmem>>, vector<384x128xf32>
    %cst_8 = arith.constant dense<0.000000e+00> : vector<8x128xf32>
    %9 = tpu.matmul %7, %8, %cst_8 {dimension_numbers = #tpu.dot_dimension_numbers<[1], [0], [0], [1], [0, 0, 1, 1], [], []>} : vector<8x384xf32>, vector<384x128xf32>, vector<8x128xf32> -> vector<8x128xf32>
    %c0_9 = arith.constant 0 : index
    %c0_10 = arith.constant 0 : index
    %10 = vector.load %arg5[%c0_9, %c0_10] : memref<1x128xf32, #tpu.memory_space<vmem>>, vector<1x128xf32>
    %11 = vector.broadcast %10 : vector<1x128xf32> to vector<8x128xf32>
    %12 = arith.addf %9, %11 : vector<8x128xf32>
    %cst_11 = arith.constant 0.000000e+00 : f32
    %13 = vector.broadcast %cst_11 : f32 to vector<8x128xf32>
    %14 = arith.maximumf %12, %13 : vector<8x128xf32>
    %c0_12 = arith.constant 0 : index
    %c0_13 = arith.constant 0 : index
    %15 = vector.load %arg6[%c0_12, %c0_13] : memref<128x128xf32, #tpu.memory_space<vmem>>, vector<128x128xf32>
    %cst_14 = arith.constant dense<0.000000e+00> : vector<8x128xf32>
    %16 = tpu.matmul %14, %15, %cst_14 {dimension_numbers = #tpu.dot_dimension_numbers<[1], [0], [0], [1], [0, 0, 1, 1], [], []>} : vector<8x128xf32>, vector<128x128xf32>, vector<8x128xf32> -> vector<8x128xf32>
    %c0_15 = arith.constant 0 : index
    %c0_16 = arith.constant 0 : index
    %17 = vector.load %arg7[%c0_15, %c0_16] : memref<1x128xf32, #tpu.memory_space<vmem>>, vector<1x128xf32>
    %18 = vector.broadcast %17 : vector<1x128xf32> to vector<8x128xf32>
    %19 = arith.addf %16, %18 : vector<8x128xf32>
    %c0_17 = arith.constant 0 : index
    %c0_18 = arith.constant 0 : index
    %20 = vector.load %arg8[%c0_17, %c0_18] : memref<8x128xf32, #tpu.memory_space<vmem>>, vector<8x128xf32>
    tpu.vector_store %arg8[%c0_17, %c0_18], %19 {strides = array<i32>} : memref<8x128xf32, #tpu.memory_space<vmem>>, vector<8x128xf32>,
    return
  }
  func.func @transform_0(%arg0: i32) -> (i32, i32) {
    %c0_i32 = arith.constant 0 : i32
    %c0_i32_0 = arith.constant 0 : i32
    return %arg0, %c0_i32 : i32, i32
  }
  func.func @transform_1(%arg0: i32) -> (i32, i32) {
    %c0_i32 = arith.constant 0 : i32
    %c0_i32_0 = arith.constant 0 : i32
    %c0_i32_1 = arith.constant 0 : i32
    return %c0_i32, %c0_i32_0 : i32, i32
  }
  func.func @transform_2(%arg0: i32) -> (i32, i32) {
    %c0_i32 = arith.constant 0 : i32
    %c0_i32_0 = arith.constant 0 : i32
    %c0_i32_1 = arith.constant 0 : i32
    return %c0_i32, %c0_i32_0 : i32, i32
  }
  func.func @transform_3(%arg0: i32) -> (i32, i32) {
    %c0_i32 = arith.constant 0 : i32
    %c0_i32_0 = arith.constant 0 : i32
    %c0_i32_1 = arith.constant 0 : i32
    return %c0_i32, %c0_i32_0 : i32, i32
  }
  func.func @transform_4(%arg0: i32) -> (i32, i32) {
    %c0_i32 = arith.constant 0 : i32
    %c0_i32_0 = arith.constant 0 : i32
    %c0_i32_1 = arith.constant 0 : i32
    return %c0_i32, %c0_i32_0 : i32, i32
  }
  func.func @transform_5(%arg0: i32) -> (i32, i32) {
    %c0_i32 = arith.constant 0 : i32
    %c0_i32_0 = arith.constant 0 : i32
    %c0_i32_1 = arith.constant 0 : i32
    return %c0_i32, %c0_i32_0 : i32, i32
  }
  func.func @transform_6(%arg0: i32) -> (i32, i32) {
    %c0_i32 = arith.constant 0 : i32
    %c0_i32_0 = arith.constant 0 : i32
    %c0_i32_1 = arith.constant 0 : i32
    return %c0_i32, %c0_i32_0 : i32, i32
  }
  func.func @transform_7(%arg0: i32) -> (i32, i32) {
    %c0_i32 = arith.constant 0 : i32
    %c0_i32_0 = arith.constant 0 : i32
    return %arg0, %c0_i32 : i32, i32
  }
}

</mosaic_0001>

<bundles_post_ra>
// kernel: tpu_custom_call.1
= control target key start
LH: loop header
LB: loop body
LE: loop exit
PB: predicated region body
PF: predicated region fallthrough
CT: control target
= control target key end

     0   :  { %12 = vsyncpa [#allocation3], 0  ;;  %s1271_s0 = inlined_call_operand.hbm [shape: f32[8,256], index: 0, kind: input, shape index: {}]   ;;  %s1272_s1 = inlined_call_operand.hbm [shape: f32[256,384], index: 1, kind: input, shape index: {}]   ;;  %s1273_s2 = inlined_call_operand.vmem [shape: f32[1,384], index: 2, kind: input, shape index: {}]   ;;  %s1274_s3 = inlined_call_operand.hbm [shape: f32[384,128], index: 3, kind: input, shape index: {}]   ;;  %s1275_s4 = inlined_call_operand.vmem [shape: f32[1,128], index: 4, kind: input, shape index: {}]   ;;  %s1276_s5 = inlined_call_operand.hbm [shape: f32[128,128], index: 5, kind: input, shape index: {}]   ;;  %s1277_s6 = inlined_call_operand.vmem [shape: f32[1,128], index: 6, kind: input, shape index: {}]   ;;  %s1278_s7 = inlined_call_operand.hbm [shape: f32[8,128], index: 7, kind: output, shape index: {}]  }
   0x1   :  { %13 = vsyncpa [#allocation6], 0 }
   0x2   :  { %14 = vsyncpa [#allocation9], 0 }
   0x3   :  { %15 = vsyncpa [#allocation4], 0  ;;  %s1128_s24 = smov [#allocation5]   ;;  %s1010_s28 = scalar_lea.hbm %s1272_s1, 12288 }
   0x4   :  { %s31_s25 = sshll.u32 %s1128_s24, 4  ;;  %p1011_p0 = scmp.ne.s32.totalorder %s1272_s1, %s1010_s28  ;;  %s32_s25 = int_to_ptr.vmem [resolvable:$true] %s31_s25 }
   0x5   :  { %p1014_p1 = scmp.lt.u32.totalorder %s1010_s28, %s1272_s1 }
   0x7   :  { %p1016_p2 = pnand %p1014_p1, %p1011_p0 }
   0x9   :  { %1019 = shalt.err (!%p1016_p2)
}
   0xa   :  { %s1020_s10 = scalar_lea.vmem %s32_s25, 12288  ;;  %p1025_p4 = scmp.lt.s32.totalorder %s32_s25, %s32_s25 }
   0xb   :  { %p1021_p3 = scmp.ne.s32.totalorder %s32_s25, %s1020_s10  ;;  %p1026_p5 = scmp.lt.s32.totalorder %s1020_s10, %s1020_s10 }
   0xd   :  { %p1027_p6 = por %p1026_p5, %p1025_p4 }
   0xf   :  { %p1028_p7 = pnand %p1027_p6, %p1021_p3 }
  0x11   :  { %1031 = shalt.err (!%p1028_p7)
}
  0x12   :  { %s1129_s11 = smov 384   ;;  %s1130_s12 = smov 24  }
  0x13   :  { %37 = dma.hbm_to_vmem [thread:$0]  %s1272_s1, 12288, %s32_s25, [#allocation6], %s1129_s11, %s1129_s11, %s1130_s12  }
  0x14   :  { %s1131_s15 = smov [#allocation2]   ;;  %s1132_s17 = smov [#allocation7]  }
  0x15   :  { %s22_s16 = sshll.u32 %s1131_s15, 4  ;;  %s45_s18 = sshll.u32 %s1132_s17, 4  ;;  %s23_s16 = int_to_ptr.vmem [resolvable:$true] %s22_s16  ;;  %s46_s18 = int_to_ptr.vmem [resolvable:$true] %s45_s18 }
  0x16   :  { %s1032_s21 = scalar_lea.hbm %s1271_s0, 256 }
  0x17   :  { %p1033_p8 = scmp.ne.s32.totalorder %s1271_s0, %s1032_s21  ;;  %p1036_p9 = scmp.lt.u32.totalorder %s1032_s21, %s1271_s0 }
  0x19   :  { %p1038_p10 = pnand %p1036_p9, %p1033_p8 }
  0x1b   :  { %1041 = shalt.err (!%p1038_p10)
}
  0x1c   :  { %s1042_s1 = scalar_lea.vmem %s23_s16, 256  ;;  %p1047_p12 = scmp.lt.s32.totalorder %s23_s16, %s23_s16 }
  0x1d   :  { %p1043_p11 = scmp.ne.s32.totalorder %s23_s16, %s1042_s1  ;;  %p1048_p13 = scmp.lt.s32.totalorder %s1042_s1, %s1042_s1 }
  0x1f   :  { %p1049_p0 = por %p1048_p13, %p1047_p12 }
  0x21   :  { %p1050_p1 = pnand %p1049_p0, %p1043_p11 }
  0x23   :  { %1053 = shalt.err (!%p1050_p1)
}
  0x24   :  { %25 = dma.hbm_to_vmem [thread:$0]  %s1271_s0, 256, %s23_s16, [#allocation3]  }
  0x25   :  { %s1054_s30 = scalar_lea.hbm %s1274_s3, 6144 }
  0x26   :  { %p1055_p2 = scmp.ne.s32.totalorder %s1274_s3, %s1054_s30  ;;  %p1058_p3 = scmp.lt.u32.totalorder %s1054_s30, %s1274_s3 }
  0x28   :  { %p1060_p4 = pnand %p1058_p3, %p1055_p2 }
  0x2a   :  { %1063 = shalt.err (!%p1060_p4)
}
  0x2b   :  { %s1064_s12 = scalar_lea.vmem %s46_s18, 6144  ;;  %p1069_p6 = scmp.lt.s32.totalorder %s46_s18, %s46_s18 }
  0x2c   :  { %p1065_p5 = scmp.ne.s32.totalorder %s46_s18, %s1064_s12  ;;  %p1070_p7 = scmp.lt.s32.totalorder %s1064_s12, %s1064_s12 }
  0x2e   :  { %p1071_p8 = por %p1070_p7, %p1069_p6 }
  0x30   :  { %p1072_p9 = pnand %p1071_p8, %p1065_p5 }
  0x32   :  { %1075 = shalt.err (!%p1072_p9)
}
  0x33   :  { %s1133_s0 = smov 128   ;;  %s1134_s13 = smov 8  }
  0x34   :  { %51 = dma.hbm_to_vmem [thread:$0]  %s1274_s3, 6144, %s46_s18, [#allocation6], %s1133_s0, %s1133_s0, %s1134_s13  }
  0x35   :  { %s1135_s16 = smov [#allocation8]   ;;  %s1076_s21 = scalar_lea.hbm %s1276_s5, 2048 }
  0x36   :  { %s59_s17 = sshll.u32 %s1135_s16, 4  ;;  %p1077_p10 = scmp.ne.s32.totalorder %s1276_s5, %s1076_s21  ;;  %s60_s17 = int_to_ptr.vmem [resolvable:$true] %s59_s17 }
  0x37   :  { %p1080_p11 = scmp.lt.u32.totalorder %s1076_s21, %s1276_s5 }
  0x39   :  { %p1082_p12 = pnand %p1080_p11, %p1077_p10 }
  0x3b   :  { %1085 = shalt.err (!%p1082_p12)
}
  0x3c   :  { %s1086_s1 = scalar_lea.vmem %s60_s17, 2048  ;;  %p1091_p0 = scmp.lt.s32.totalorder %s60_s17, %s60_s17 }
  0x3d   :  { %p1087_p13 = scmp.ne.s32.totalorder %s60_s17, %s1086_s1  ;;  %p1092_p1 = scmp.lt.s32.totalorder %s1086_s1, %s1086_s1 }
  0x3f   :  { %p1093_p2 = por %p1092_p1, %p1091_p0 }
  0x41   :  { %p1094_p3 = pnand %p1093_p2, %p1087_p13 }
  0x43   :  { %1097 = shalt.err (!%p1094_p3)
}
  0x44   :  { %65 = dma.hbm_to_vmem [thread:$0]  %s1276_s5, 2048, %s60_s17, [#allocation9], %s1133_s0, %s1133_s0, %s1134_s13  }
  0x45   :  { %1120 = dma.done.wait [#allocation3], 256  }
  0x46   :  { %1121 = vsyncadd [#allocation3], 4294967040 }
  0x47   :  { %1122 = dma.done.wait [#allocation6], 18432  }
  0x48   :  { %1123 = vsyncadd [#allocation6], 4294948864 }
  0x49   :  { %1124 = dma.done.wait [#allocation9], 2048  }
  0x4a   :  { %1125 = vsyncadd [#allocation9], 4294965248  ;;  %v83_v0 = vld [vmem:[#allocation5 + $0x8] sm:$0xff]  ;;  %v86_v1 = vld [vmem:[#allocation5 + $0x20] sm:$0xff]  ;;  %vm1137_vm0 = vmmov 0   ;;  %s1139_s30 = smov [#allocation10]  }
  0x4b   :  { %v82_v2 = vld [vmem:[#allocation5] sm:$0xff]  ;;  %v822_v3 = vpack.c.bf16 %v86_v1, %v83_v0  ;;  %v85_v4 = vld [vmem:[#allocation5 + $0x18] sm:$0xff]  ;;  %v92_v6 = vld [vmem:[#allocation5 + $0x50] sm:$0xff]  ;;  %s635_s8 = sshll.u32 %s1139_s30, 4  ;;  %s636_s8 = int_to_ptr.vmem [resolvable:$true] %s635_s8 }
  0x4c   :  { %v89_v5 = vld [vmem:[#allocation5 + $0x38] sm:$0xff]  ;;  %v824_v7 = vpack.c.bf16 %v85_v4, %v82_v2  ;;  %v88_v9 = vld [vmem:[#allocation5 + $0x30] sm:$0xff]  ;;  %v91_v10 = vld [vmem:[#allocation5 + $0x48] sm:$0xff]  ;;  %s1098_s9 = scalar_lea.vmem %s636_s8, 128  ;;  %p1103_p5 = scmp.lt.s32.totalorder %s636_s8, %s636_s8 }
  0x4d   :  { %v826_v8 = vpack.c.bf16 %v92_v6, %v89_v5  ;;  %v95_v11 = vld [vmem:[#allocation5 + $0x68] sm:$0xff]  ;;  %823 = vmatprep.subr.bf16.mxu0 %v822_v3  ;;  %v98_v12 = vld [vmem:[#allocation5 + $0x80] sm:$0xff]  ;;  %v828_v13 = vpack.c.bf16 %v91_v10, %v88_v9  ;;  %v97_v16 = vld [vmem:[#allocation5 + $0x78] sm:$0xff]  ;;  %p1099_p4 = scmp.ne.s32.totalorder %s636_s8, %s1098_s9  ;;  %p1104_p6 = scmp.lt.s32.totalorder %s1098_s9, %s1098_s9 }
  0x4e   :  { %825 = vmatpush1.bf16.msra.mxu0 %v824_v7  ;;  %v830_v14 = vpack.c.bf16 %v98_v12, %v95_v11  ;;  %v94_v15 = vld [vmem:[#allocation5 + $0x60] sm:$0xff]  ;;  %v101_v17 = vld [vmem:[#allocation5 + $0x98] sm:$0xff]  ;;  %v104_v18 = vld [vmem:[#allocation5 + $0xb0] sm:$0xff] }
  0x4f   :  { %827 = vmatprep.subr.bf16.mxu0 %v826_v8  ;;  %v832_v19 = vpack.c.bf16 %v97_v16, %v94_v15  ;;  %v834_v20 = vpack.c.bf16 %v104_v18, %v101_v17  ;;  %v100_v21 = vld [vmem:[#allocation5 + $0x90] sm:$0xff]  ;;  %v103_v22 = vld [vmem:[#allocation5 + $0xa8] sm:$0xff]  ;;  %v110_v24 = vld [vmem:[#allocation5 + $0xe0] sm:$0xff]  ;;  %p1105_p7 = por %p1104_p6, %p1103_p5 }
  0x50   :  { %v107_v23 = vld [vmem:[#allocation5 + $0xc8] sm:$0xff]  ;;  %v836_v25 = vpack.c.bf16 %v103_v22, %v100_v21  ;;  %v132_v26 = vld [vmem:[#allocation5 + $0x190] sm:$0xff]  ;;  %v106_v30 = vld [vmem:[#allocation5 + $0xc0] sm:$0xff] }
  0x51   :  { %v135_v27 = vld [vmem:[#allocation5 + $0x1a8] sm:$0xff]  ;;  %v84_v28 = vld [vmem:[#allocation5 + $0x10] sm:$0xff]  ;;  %v838_v29 = vpack.c.bf16 %v110_v24, %v107_v23  ;;  %v109_v31 = vld [vmem:[#allocation5 + $0xd8] sm:$0xff]  ;;  %p1106_p8 = pnand %p1105_p7, %p1099_p4 }
  0x52   :  { %829 = vmatpush1.bf16.msra.mxu0 %v828_v13  ;;  %v886_v32 = vpack.c.bf16 %v135_v27, %v132_v26  ;;  %v87_v33 = vld [vmem:[#allocation5 + $0x28] sm:$0xff]  ;;  %v113_v34 = vld [vmem:[#allocation5 + $0xf8] sm:$0xff]  ;;  %v116_v35 = vld [vmem:[#allocation5 + $0x110] sm:$0xff]  ;;  %v840_v41 = vpack.c.bf16 %v109_v31, %v106_v30 }
  0x53   :  { %831 = vmatprep.subr.bf16.mxu0 %v830_v14  ;;  %v888_v36 = vpack.c.bf16 %v87_v33, %v84_v28  ;;  %v138_v37 = vld [vmem:[#allocation5 + $0x1c0] sm:$0xff]  ;;  %v141_v38 = vld [vmem:[#allocation5 + $0x1d8] sm:$0xff]  ;;  %v112_v42 = vld [vmem:[#allocation5 + $0xf0] sm:$0xff]  ;;  %v842_v46 = vpack.c.bf16 %v116_v35, %v113_v34 }
  0x54   :  { %887 = vmatprep.subr.bf16.mxu1 %v886_v32  ;;  %v90_v39 = vld [vmem:[#allocation5 + $0x40] sm:$0xff]  ;;  %v93_v40 = vld [vmem:[#allocation5 + $0x58] sm:$0xff]  ;;  %v115_v43 = vld [vmem:[#allocation5 + $0x108] sm:$0xff]  ;;  %v890_v44 = vpack.c.bf16 %v141_v38, %v138_v37 }
  0x55   :  { %889 = vmatpush3.bf16.msra.mxu1 %v888_v36  ;;  %v892_v45 = vpack.c.bf16 %v93_v40, %v90_v39  ;;  %v119_v47 = vld [vmem:[#allocation5 + $0x128] sm:$0xff]  ;;  %v144_v48 = vld [vmem:[#allocation5 + $0x1f0] sm:$0xff]  ;;  %v122_v50 = vld [vmem:[#allocation5 + $0x140] sm:$0xff]  ;;  %v844_v54 = vpack.c.bf16 %v115_v43, %v112_v42 }
  0x56   :  { %833 = vmatpush1.bf16.msra.mxu0 %v832_v19  ;;  %v147_v49 = vld [vmem:[#allocation5 + $0x208] sm:$0xff]  ;;  %891 = vmatprep.subr.bf16.mxu1 %v890_v44  ;;  %v96_v52 = vld [vmem:[#allocation5 + $0x70] sm:$0xff]  ;;  %v118_v55 = vld [vmem:[#allocation5 + $0x120] sm:$0xff]  ;;  %v846_v59 = vpack.c.bf16 %v122_v50, %v119_v47 }
  0x57   :  { %835 = vmatprep.subr.bf16.mxu0 %v834_v20  ;;  %v894_v51 = vpack.c.bf16 %v147_v49, %v144_v48  ;;  %v99_v53 = vld [vmem:[#allocation5 + $0x88] sm:$0xff]  ;;  %v150_v57 = vld [vmem:[#allocation5 + $0x220] sm:$0xff]  ;;  %v153_v58 = vld [vmem:[#allocation5 + $0x238] sm:$0xff] }
  0x58   :  { %v896_v56 = vpack.c.bf16 %v99_v53, %v96_v52  ;;  %v121_v60 = vld [vmem:[#allocation5 + $0x138] sm:$0xff]  ;;  %v898_v61 = vpack.c.bf16 %v153_v58, %v150_v57  ;;  %v102_v62 = vld [vmem:[#allocation5 + $0xa0] sm:$0xff]  ;;  %v128_v1 = vld [vmem:[#allocation5 + $0x170] sm:$0xff] }
  0x59   :  { %893 = vmatpush3.bf16.msra.mxu1 %v892_v45  ;;  %v105_v63 = vld [vmem:[#allocation5 + $0xb8] sm:$0xff]  ;;  %v156_v2 = vld [vmem:[#allocation5 + $0x250] sm:$0xff]  ;;  %v159_v3 = vld [vmem:[#allocation5 + $0x268] sm:$0xff]  ;;  %v848_v4 = vpack.c.bf16 %v121_v60, %v118_v55 }
  0x5a   :  { %837 = vmatpush1.bf16.msra.mxu0 %v836_v25  ;;  %895 = vmatprep.subr.bf16.mxu1 %v894_v51  ;;  %v125_v0 = vld [vmem:[#allocation5 + $0x158] sm:$0xff]  ;;  %v124_v5 = vld [vmem:[#allocation5 + $0x150] sm:$0xff]  ;;  %v127_v6 = vld [vmem:[#allocation5 + $0x168] sm:$0xff]  ;;  %v900_v7 = vpack.c.bf16 %v105_v63, %v102_v62  ;;  %v902_v10 = vpack.c.bf16 %v159_v3, %v156_v2 }
  0x5b   :  { %839 = vmatprep.subr.bf16.mxu0 %v838_v29  ;;  %v850_v8 = vpack.c.bf16 %v128_v1, %v125_v0  ;;  %v131_v9 = vld [vmem:[#allocation5 + $0x188] sm:$0xff]  ;;  %v108_v11 = vld [vmem:[#allocation5 + $0xd0] sm:$0xff]  ;;  %v134_v13 = vld [vmem:[#allocation5 + $0x1a0] sm:$0xff]  ;;  %v852_v16 = vpack.c.bf16 %v127_v6, %v124_v5 }
  0x5c   :  { %v111_v12 = vld [vmem:[#allocation5 + $0xe8] sm:$0xff]  ;;  %v162_v14 = vld [vmem:[#allocation5 + $0x280] sm:$0xff]  ;;  %v165_v15 = vld [vmem:[#allocation5 + $0x298] sm:$0xff]  ;;  %v854_v20 = vpack.c.bf16 %v134_v13, %v131_v9 }
  0x5d   :  { %897 = vmatpush3.bf16.msra.mxu1 %v896_v56  ;;  %v130_v17 = vld [vmem:[#allocation5 + $0x180] sm:$0xff]  ;;  %v133_v18 = vld [vmem:[#allocation5 + $0x198] sm:$0xff]  ;;  %v904_v19 = vpack.c.bf16 %v111_v12, %v108_v11  ;;  %v906_v22 = vpack.c.bf16 %v165_v15, %v162_v14  ;;  %v140_v25 = vld [vmem:[#allocation5 + $0x1d0] sm:$0xff] }
  0x5e   :  { %841 = vmatpush1.bf16.msra.mxu0 %v840_v41  ;;  %899 = vmatprep.subr.bf16.mxu1 %v898_v61  ;;  %v137_v21 = vld [vmem:[#allocation5 + $0x1b8] sm:$0xff]  ;;  %v114_v23 = vld [vmem:[#allocation5 + $0x100] sm:$0xff]  ;;  %v168_v26 = vld [vmem:[#allocation5 + $0x2b0] sm:$0xff]  ;;  %v856_v29 = vpack.c.bf16 %v133_v18, %v130_v17 }
  0x5f   :  { %843 = vmatprep.subr.bf16.mxu0 %v842_v46  ;;  %v117_v24 = vld [vmem:[#allocation5 + $0x118] sm:$0xff]  ;;  %v171_v27 = vld [vmem:[#allocation5 + $0x2c8] sm:$0xff]  ;;  %v136_v30 = vld [vmem:[#allocation5 + $0x1b0] sm:$0xff]  ;;  %v858_v33 = vpack.c.bf16 %v140_v25, %v137_v21 }
  0x60   :  { %v81_v28 = vld [vmem:[#allocation2 + $0x8] sm:$0xff]  ;;  %v139_v31 = vld [vmem:[#allocation5 + $0x1c8] sm:$0xff]  ;;  %v908_v32 = vpack.c.bf16 %v117_v24, %v114_v23  ;;  %v910_v35 = vpack.c.bf16 %v171_v27, %v168_v26  ;;  %v120_v36 = vld [vmem:[#allocation5 + $0x130] sm:$0xff] }
  0x61   :  { %901 = vmatpush3.bf16.msra.mxu1 %v900_v7  ;;  %v143_v34 = vld [vmem:[#allocation5 + $0x1e8] sm:$0xff]  ;;  %v146_v38 = vld [vmem:[#allocation5 + $0x200] sm:$0xff]  ;;  %v177_v40 = vld [vmem:[#allocation5 + $0x2f8] sm:$0xff]  ;;  %259 = vmatprep.mubr.f32.mxu0 %v81_v28  ;;  %v860_v41 = vpack.c.bf16 %v139_v31, %v136_v30 }
  0x62   :  { %845 = vmatpush1.bf16.msra.mxu0 %v844_v54  ;;  %903 = vmatprep.subr.bf16.mxu1 %v902_v10  ;;  %v123_v37 = vld [vmem:[#allocation5 + $0x148] sm:$0xff]  ;;  %v174_v39 = vld [vmem:[#allocation5 + $0x2e0] sm:$0xff]  ;;  %v145_v43 = vld [vmem:[#allocation5 + $0x1f8] sm:$0xff]  ;;  %v862_v45 = vpack.c.bf16 %v146_v38, %v143_v34 }
  0x63   :  { %847 = vmatprep.subr.bf16.mxu0 %v846_v59  ;;  %330 = vmatprep.mubr.f32.mxu1 %v81_v28  ;;  %v142_v42 = vld [vmem:[#allocation5 + $0x1e0] sm:$0xff]  ;;  %v912_v44 = vpack.c.bf16 %v123_v37, %v120_v36  ;;  %v149_v46 = vld [vmem:[#allocation5 + $0x218] sm:$0xff]  ;;  %v914_v47 = vpack.c.bf16 %v177_v40, %v174_v39  ;;  %v152_v50 = vld [vmem:[#allocation5 + $0x230] sm:$0xff] }
  0x64   :  { %v126_v48 = vld [vmem:[#allocation5 + $0x160] sm:$0xff]  ;;  %v129_v49 = vld [vmem:[#allocation5 + $0x178] sm:$0xff]  ;;  %v356_v52 = vld [vmem:[#allocation7 + $0x88] sm:$0xff]  ;;  %v864_v53 = vpack.c.bf16 %v145_v43, %v142_v42  ;;  %v866_v57 = vpack.c.bf16 %v152_v50, %v149_v46 }
  0x65   :  { %905 = vmatpush3.bf16.msra.mxu1 %v904_v19  ;;  %v355_v51 = vld [vmem:[#allocation7 + $0x80] sm:$0xff]  ;;  %v148_v54 = vld [vmem:[#allocation5 + $0x210] sm:$0xff]  ;;  %v151_v55 = vld [vmem:[#allocation5 + $0x228] sm:$0xff]  ;;  %v916_v56 = vpack.c.bf16 %v129_v49, %v126_v48 }
  0x66   :  { %849 = vmatpush1.bf16.msra.mxu0 %v848_v4  ;;  %907 = vmatprep.subr.bf16.mxu1 %v906_v22  ;;  %v155_v58 = vld [vmem:[#allocation5 + $0x248] sm:$0xff]  ;;  %v918_v59 = vpack.c.bf16 %v356_v52, %v355_v51  ;;  %v339_v60 = vld [vmem:[#allocation7] sm:$0xff]  ;;  %v357_v63 = vld [vmem:[#allocation7 + $0x90] sm:$0xff]  ;;  %v868_v1 = vpack.c.bf16 %v151_v55, %v148_v54 }
  0x67   :  { %851 = vmatprep.subr.bf16.mxu0 %v850_v8  ;;  %v340_v61 = vld [vmem:[#allocation7 + $0x8] sm:$0xff]  ;;  %v158_v62 = vld [vmem:[#allocation5 + $0x260] sm:$0xff]  ;;  %v358_v0 = vld [vmem:[#allocation7 + $0x98] sm:$0xff] }
  0x68   :  { %v154_v2 = vld [vmem:[#allocation5 + $0x240] sm:$0xff]  ;;  %v157_v3 = vld [vmem:[#allocation5 + $0x258] sm:$0xff]  ;;  %v920_v5 = vpack.c.bf16 %v340_v61, %v339_v60  ;;  %v870_v6 = vpack.c.bf16 %v158_v62, %v155_v58  ;;  %v164_v7 = vld [vmem:[#allocation5 + $0x290] sm:$0xff]  ;;  %v922_v8 = vpack.c.bf16 %v358_v0, %v357_v63 }
  0x69   :  { %909 = vmatpush3.bf16.msra.mxu1 %v908_v32  ;;  %v161_v4 = vld [vmem:[#allocation5 + $0x278] sm:$0xff]  ;;  %v341_v9 = vld [vmem:[#allocation7 + $0x10] sm:$0xff]  ;;  %v359_v12 = vld [vmem:[#allocation7 + $0xa0] sm:$0xff]  ;;  %v872_v14 = vpack.c.bf16 %v157_v3, %v154_v2 }
  0x6a   :  { %853 = vmatpush1.bf16.msra.mxu0 %v852_v16  ;;  %911 = vmatprep.subr.bf16.mxu1 %v910_v35  ;;  %v342_v10 = vld [vmem:[#allocation7 + $0x18] sm:$0xff]  ;;  %v1228_v11 = vld [vmem:[#allocation2] sm:$0xff]  ;;  %v360_v13 = vld [vmem:[#allocation7 + $0xa8] sm:$0xff]  ;;  %v874_v18 = vpack.c.bf16 %v164_v7, %v161_v4 }
  0x6b   :  { %855 = vmatprep.subr.bf16.mxu0 %v854_v20  ;;  %v160_v15 = vld [vmem:[#allocation5 + $0x270] sm:$0xff]  ;;  %v163_v16 = vld [vmem:[#allocation5 + $0x288] sm:$0xff]  ;;  %v924_v17 = vpack.c.bf16 %v342_v10, %v341_v9  ;;  %v926_v20 = vpack.c.bf16 %v360_v13, %v359_v12  ;;  %v343_v21 = vld [vmem:[#allocation7 + $0x20] sm:$0xff] }
  0x6c   :  { %v167_v19 = vld [vmem:[#allocation5 + $0x2a8] sm:$0xff]  ;;  %v170_v23 = vld [vmem:[#allocation5 + $0x2c0] sm:$0xff]  ;;  %v361_v24 = vld [vmem:[#allocation7 + $0xb0] sm:$0xff]  ;;  %v876_v26 = vpack.c.bf16 %v163_v16, %v160_v15 }
  0x6d   :  { %913 = vmatpush3.bf16.msra.mxu1 %v912_v44  ;;  %v344_v22 = vld [vmem:[#allocation7 + $0x28] sm:$0xff]  ;;  %v362_v25 = vld [vmem:[#allocation7 + $0xb8] sm:$0xff]  ;;  %v166_v27 = vld [vmem:[#allocation5 + $0x2a0] sm:$0xff]  ;;  %v878_v30 = vpack.c.bf16 %v170_v23, %v167_v19 }
  0x6e   :  { %857 = vmatpush1.bf16.msra.mxu0 %v856_v29  ;;  %915 = vmatprep.subr.bf16.mxu1 %v914_v47  ;;  %v169_v28 = vld [vmem:[#allocation5 + $0x2b8] sm:$0xff]  ;;  %v928_v29 = vpack.c.bf16 %v344_v22, %v343_v21  ;;  %v930_v32 = vpack.c.bf16 %v362_v25, %v361_v24  ;;  %v176_v35 = vld [vmem:[#allocation5 + $0x2f0] sm:$0xff]  ;;  %v363_v36 = vld [vmem:[#allocation7 + $0xc0] sm:$0xff] }
  0x6f   :  { %859 = vmatprep.subr.bf16.mxu0 %v858_v33  ;;  %v173_v31 = vld [vmem:[#allocation5 + $0x2d8] sm:$0xff]  ;;  %v345_v33 = vld [vmem:[#allocation7 + $0x30] sm:$0xff]  ;;  %v364_v37 = vld [vmem:[#allocation7 + $0xc8] sm:$0xff]  ;;  %v880_v38 = vpack.c.bf16 %v169_v28, %v166_v27  ;;  %v1138_v27 = vmov 0.0   ;;  %v180_v28 = vlaneseq }
  0x70   :  { %v346_v34 = vld [vmem:[#allocation7 + $0x38] sm:$0xff]  ;;  %v172_v39 = vld [vmem:[#allocation5 + $0x2d0] sm:$0xff]  ;;  %v175_v42 = vld [vmem:[#allocation5 + $0x2e8] sm:$0xff]  ;;  %v934_v43 = vpack.c.bf16 %v364_v37, %v363_v36 }
  0x71   :  { %917 = vmatpush3.bf16.msra.mxu1 %v916_v56  ;;  %v932_v40 = vpack.c.bf16 %v346_v34, %v345_v33  ;;  %v347_v44 = vld [vmem:[#allocation7 + $0x40] sm:$0xff]  ;;  %v365_v46 = vld [vmem:[#allocation7 + $0xd0] sm:$0xff]  ;;  %v366_v47 = vld [vmem:[#allocation7 + $0xd8] sm:$0xff]  ;;  %v884_v48 = vpack.c.bf16 %v175_v42, %v172_v39 }
  0x72   :  { %861 = vmatpush1.bf16.msra.mxu0 %v860_v41  ;;  %919 = vmatprep.subr.bf16.mxu1 %v918_v59  ;;  %v882_v41 = vpack.c.bf16 %v176_v35, %v173_v31  ;;  %v371_v49 = vld [vmem:[#allocation7 + $0x100] sm:$0xff]  ;;  %v372_v51 = vld [vmem:[#allocation7 + $0x108] sm:$0xff]  ;;  %v938_v52 = vpack.c.bf16 %v366_v47, %v365_v46  ;;  %v350_v54 = vld [vmem:[#allocation7 + $0x58] sm:$0xff]  ;;  %v1136_v59 = vmov 0.0|0.0  }
  0x73   :  { %863 = vmatprep.subr.bf16.mxu0 %v862_v45  ;;  %v348_v45 = vld [vmem:[#allocation7 + $0x48] sm:$0xff]  ;;  %v367_v55 = vld [vmem:[#allocation7 + $0xe0] sm:$0xff]  ;;  %v373_v60 = vld [vmem:[#allocation7 + $0x110] sm:$0xff] }
  0x74   :  { %331 = vmatmul.mubr.f32.vlgmr.msra.gmra.mrb[0].mxu1 %v1228_v11  ;;  %v936_v50 = vpack.c.bf16 %v348_v45, %v347_v44  ;;  %v368_v56 = vld [vmem:[#allocation7 + $0xe8] sm:$0xff]  ;;  %v374_v61 = vld [vmem:[#allocation7 + $0x118] sm:$0xff]  ;;  %v375_v0 = vld [vmem:[#allocation7 + $0x120] sm:$0xff] }
  0x75   :  { %921 = vmatpush3.bf16.msra.mxu1 %v920_v5  ;;  %v942_v62 = vpack.c.bf16 %v368_v56, %v367_v55  ;;  %v954_v63 = vpack.c.bf16 %v374_v61, %v373_v60  ;;  %v377_v3 = vld [vmem:[#allocation7 + $0x130] sm:$0xff]  ;;  %v378_v4 = vld [vmem:[#allocation7 + $0x138] sm:$0xff]  ;;  %v380_v7 = vld [vmem:[#allocation7 + $0x148] sm:$0xff] }
  0x76   :  { %865 = vmatpush1.bf16.msra.mxu0 %v864_v53  ;;  %923 = vmatprep.subr.bf16.mxu1 %v922_v8  ;;  %v349_v53 = vld [vmem:[#allocation7 + $0x50] sm:$0xff]  ;;  %v960_v5 = vpack.c.bf16 %v378_v4, %v377_v3  ;;  %v382_v10 = vld [vmem:[#allocation7 + $0x158] sm:$0xff]  ;;  %v351_v12 = vld [vmem:[#allocation7 + $0x60] sm:$0xff] }
  0x77   :  { %867 = vmatprep.subr.bf16.mxu0 %v866_v57  ;;  %v951_v57 = vpack.c.bf16 %v372_v51, %v371_v49  ;;  %v940_v58 = vpack.c.bf16 %v350_v54, %v349_v53  ;;  %v381_v9 = vld [vmem:[#allocation7 + $0x150] sm:$0xff]  ;;  %v352_v13 = vld [vmem:[#allocation7 + $0x68] sm:$0xff]  ;;  %v370_v16 = vld [vmem:[#allocation7 + $0xf8] sm:$0xff] }
  0x78   :  { %v369_v15 = vld [vmem:[#allocation7 + $0xf0] sm:$0xff]  ;;  %v384_v19 = vld [vmem:[#allocation7 + $0x168] sm:$0xff]  ;;  %v354_v21 = vld [vmem:[#allocation7 + $0x78] sm:$0xff] }
  0x79   :  { %925 = vmatpush3.bf16.msra.mxu1 %v924_v17  ;;  %v383_v17 = vld [vmem:[#allocation7 + $0x160] sm:$0xff]  ;;  %v385_v24 = vld [vmem:[#allocation7 + $0x170] sm:$0xff]  ;;  %v386_v25 = vld [vmem:[#allocation7 + $0x178] sm:$0xff] }
  0x7a   :  { %869 = vmatpush1.bf16.msra.mxu0 %v868_v1  ;;  %927 = vmatprep.subr.bf16.mxu1 %v926_v20  ;;  %v376_v1 = vld [vmem:[#allocation7 + $0x128] sm:$0xff]  ;;  %v353_v20 = vld [vmem:[#allocation7 + $0x70] sm:$0xff]  ;;  %v969_v22 = vpack.c.bf16 %v384_v19, %v383_v17  ;;  %v535_v45 = vld [vmem:[#allocation8] sm:$0xff] }
  0x7b   :  { %871 = vmatprep.subr.bf16.mxu0 %v870_v6  ;;  %v957_v2 = vpack.c.bf16 %v376_v1, %v375_v0  ;;  %v379_v6 = vld [vmem:[#allocation7 + $0x140] sm:$0xff]  ;;  %v948_v23 = vpack.c.bf16 %v354_v21, %v353_v20  ;;  %v178_v31 = vld [vmem:[%s1273_s2] sm:$0x7]  ;;  %v536_v46 = vld [vmem:[#allocation8 + $0x8] sm:$0xff] }
  0x7c   :  { %v963_v8 = vpack.c.bf16 %v380_v7, %v379_v6  ;;  %v975_v49 = vpack.c.bf16 %v536_v46, %v535_v45  ;;  %v537_v51 = vld [vmem:[#allocation8 + $0x10] sm:$0xff]  ;;  %v539_v54 = vld [vmem:[#allocation8 + $0x20] sm:$0xff]  ;;  %v540_v55 = vld [vmem:[#allocation8 + $0x28] sm:$0xff] }
  0x7d   :  { %929 = vmatpush3.bf16.msra.mxu1 %v928_v29  ;;  %v181_v29 = vshrl.u32 %v180_v28, 7  ;;  %v981_v56 = vpack.c.bf16 %v540_v55, %v539_v54  ;;  %v543_v61 = vld [vmem:[#allocation8 + $0x40] sm:$0xff]  ;;  %v545_v0 = vld [vmem:[#allocation8 + $0x50] sm:$0xff]  ;;  %v546_v1 = vld [vmem:[#allocation8 + $0x58] sm:$0xff] }
  0x7e   :  { %873 = vmatpush1.bf16.msra.mxu0 %v872_v14  ;;  %931 = vmatprep.subr.bf16.mxu1 %v930_v32  ;;  %v944_v14 = vpack.c.bf16 %v352_v13, %v351_v12  ;;  %v547_v3 = vld [vmem:[#allocation8 + $0x60] sm:$0xff]  ;;  %v548_v4 = vld [vmem:[#allocation8 + $0x68] sm:$0xff]  ;;  %v549_v6 = vld [vmem:[#allocation8 + $0x70] sm:$0xff] }
  0x7f   :  { %875 = vmatprep.subr.bf16.mxu0 %v874_v18  ;;  %v946_v18 = vpack.c.bf16 %v370_v16, %v369_v15  ;;  %v186_v39 = vsub.s32 1, %v181_v29  ;;  %v550_v7 = vld [vmem:[#allocation8 + $0x78] sm:$0xff]  ;;  %v646_v13 = vld [vmem:[%s1275_s4] ss:$0 sm:$0xff] }
  0x81   :  { %933 = vmatpush3.bf16.msra.mxu1 %v932_v40 }
  0x82   :  { %877 = vmatpush1.bf16.msra.mxu0 %v876_v26  ;;  %935 = vmatprep.subr.bf16.mxu1 %v934_v43  ;;  %v972_v26 = vpack.c.bf16 %v386_v25, %v385_v24 }
  0x83   :  { %879 = vmatprep.subr.bf16.mxu0 %v878_v30  ;;  %v190_v30 = vsub.s32 2, %v181_v29 }
  0x85   :  { %937 = vmatpush3.bf16.msra.mxu1 %v936_v50  ;;  %v191_v33 = vrot.slane %v178_v31, %v190_v30 }
  0x86   :  { %881 = vmatpush1.bf16.msra.mxu0 %v880_v38  ;;  %939 = vmatprep.subr.bf16.mxu1 %v938_v52  ;;  %v182_v38 = vsub.s32 0, %v181_v29  ;;  %v538_v52 = vld [vmem:[#allocation8 + $0x18] sm:$0xff] }
  0x87   :  { %883 = vmatprep.subr.bf16.mxu0 %v882_v41  ;;  %v187_v41 = vrot.slane %v178_v31, %v186_v39  ;;  %v978_v53 = vpack.c.bf16 %v538_v52, %v537_v51 }
  0x88   :  { %v183_v40 = vrot.slane %v178_v31, %v182_v38 }
  0x89   :  { %941 = vmatpush3.bf16.msra.mxu1 %v940_v58  ;;  %v542_v58 = vld [vmem:[#allocation8 + $0x38] sm:$0xff] }
  0x8a   :  { %885 = vmatpush1.bf16.msra.mxu0 %v884_v48  ;;  %943 = vmatprep.subr.bf16.mxu1 %v942_v62  ;;  %v544_v62 = vld [vmem:[#allocation8 + $0x48] sm:$0xff] }
  0x8b   :  { %950 = vmatprep.subr.bf16.mxu0 %v1136_v59 }
  0x8d   :  { %260 = vmatmul.mubr.f32.vlgmr.msra.gmra.mrb[0].mxu0 %v1228_v11  ;;  %v966_v11 = vpack.c.bf16 %v382_v10, %v381_v9  ;;  %945 = vmatpush3.bf16.msra.mxu1 %v944_v14 }
  0x8e   :  { %952 = vmatpush3.bf16.msra.mxu0 %v951_v57  ;;  %947 = vmatprep.subr.bf16.mxu1 %v946_v18  ;;  %v541_v57 = vld [vmem:[#allocation8 + $0x30] sm:$0xff] }
  0x8f   :  { %953 = vmatprep.subr.bf16.mxu0 %v1136_v59  ;;  %784 = vmatprep.mubr.msk.f32.mxu0 %vm1137_vm0, %v1138_v27  ;;  %v984_v60 = vpack.c.bf16 %v542_v58, %v541_v57 }
  0x91   :  { %949 = vmatpush3.bf16.msra.mxu1 %v948_v23 }
  0x92   :  { %955 = vmatpush3.bf16.msra.mxu0 %v954_v63  ;;  %974 = vmatprep.subr.bf16.mxu1 %v1136_v59  ;;  %v987_v63 = vpack.c.bf16 %v544_v62, %v543_v61 }
  0x93   :  { %956 = vmatprep.subr.bf16.mxu0 %v1136_v59 }
  0x96   :  { %958 = vmatpush3.bf16.msra.mxu0 %v957_v2  ;;  %v990_v2 = vpack.c.bf16 %v546_v1, %v545_v0 }
  0x97   :  { %959 = vmatprep.subr.bf16.mxu0 %v1136_v59 }
  0x9a   :  { %961 = vmatpush3.bf16.msra.mxu0 %v960_v5  ;;  %v993_v5 = vpack.c.bf16 %v548_v4, %v547_v3 }
  0x9b   :  { %962 = vmatprep.subr.bf16.mxu0 %v1136_v59 }
  0x9e   :  { %964 = vmatpush3.bf16.msra.mxu0 %v963_v8  ;;  %v996_v8 = vpack.c.bf16 %v550_v7, %v549_v6 }
  0x9f   :  { %965 = vmatprep.subr.bf16.mxu0 %v1136_v59 }
  0xa2   :  { %967 = vmatpush3.bf16.msra.mxu0 %v966_v11 }
  0xa3   :  { %968 = vmatprep.subr.bf16.mxu0 %v1136_v59 }
  0xa6   :  { %970 = vmatpush3.bf16.msra.mxu0 %v969_v22 }
  0xa7   :  { %971 = vmatprep.subr.bf16.mxu0 %v1136_v59 }
  0xaa   :  { %973 = vmatpush3.bf16.msra.mxu0 %v972_v26 }
 0x147   :  { %v680_v32 = vpop.f32.mrb[0].mxu1 }
 0x148   :  { %v681_v34 = vpop.f32.mrb[1].mxu1 }
 0x149   :  { %v682_v35 = vadd.f32 %v681_v34, %v680_v32 }
 0x14b   :  { %v333_v36 = vadd.f32 %v682_v35, %v191_v33 }
 0x14d   :  { %v338_v37 = vmax.f32 %v333_v36, 0.0 }
 0x14f   :  { %785 = vmatmul.mubr.f32.vlgmr.msra.gmra.mrb[2].mxu0 %v338_v37 }
 0x160   :  { %v261_v42 = vpop.f32.mrb[0].mxu0 }
 0x161   :  { %v262_v43 = vadd.f32 %v261_v42, %v183_v40  ;;  %v263_v44 = vpop.f32.mrb[1].mxu0 }
 0x162   :  { %v264_v47 = vadd.f32 %v263_v44, %v187_v41 }
 0x163   :  { %v336_v50 = vmax.f32 %v262_v43, 0.0 }
 0x164   :  { %v337_v48 = vmax.f32 %v264_v47, 0.0 }
 0x166   :  { %458 = vmatprep.mubr.f32.mxu1 %v337_v48 }
 0x167   :  { %459 = vmatmul.mubr.f32.vlgmr.msra.gmra.mrb[2].mxu1 %v336_v50 }
 0x168   :  { %976 = vmatpush3.bf16.msra.mxu1 %v975_v49  ;;  %819 = vmatprep.mubr.msk.f32.mxu1 %vm1137_vm0, %v1138_v27 }
 0x169   :  { %977 = vmatprep.subr.bf16.mxu1 %v1136_v59 }
 0x16c   :  { %979 = vmatpush3.bf16.msra.mxu1 %v978_v53 }
 0x16d   :  { %980 = vmatprep.subr.bf16.mxu1 %v1136_v59 }
 0x170   :  { %982 = vmatpush3.bf16.msra.mxu1 %v981_v56 }
 0x171   :  { %983 = vmatprep.subr.bf16.mxu1 %v1136_v59 }
 0x174   :  { %985 = vmatpush3.bf16.msra.mxu1 %v984_v60 }
 0x175   :  { %986 = vmatprep.subr.bf16.mxu1 %v1136_v59 }
 0x178   :  { %988 = vmatpush3.bf16.msra.mxu1 %v987_v63 }
 0x179   :  { %989 = vmatprep.subr.bf16.mxu1 %v1136_v59 }
 0x17c   :  { %991 = vmatpush3.bf16.msra.mxu1 %v990_v2 }
 0x17d   :  { %992 = vmatprep.subr.bf16.mxu1 %v1136_v59 }
 0x180   :  { %994 = vmatpush3.bf16.msra.mxu1 %v993_v5 }
 0x181   :  { %995 = vmatprep.subr.bf16.mxu1 %v1136_v59  ;;  %v647_v59 = vld [vmem:[%s1277_s6] ss:$0 sm:$0xff] }
 0x184   :  { %997 = vmatpush3.bf16.msra.mxu1 %v996_v8 }
 0x222   :  { %v530_v9 = vpop.f32.mrb[2].mxu0 }
 0x223   :  { %v786_v10 = vpop.f32.mrb[3].mxu0 }
 0x23a   :  { %v715_v11 = vpop.f32.mrb[2].mxu1 }
 0x23b   :  { %v716_v12 = vpop.f32.mrb[3].mxu1 }
 0x23c   :  { %v717_v14 = vadd.f32 %v716_v12, %v715_v11 }
 0x23e   :  { %v461_v15 = vadd.f32 %v717_v14, %v646_v13 }
 0x240   :  { %v531_v16 = vadd.f32 %v530_v9, %v461_v15 }
 0x242   :  { %v534_v17 = vmax.f32 %v531_v16, 0.0 }
 0x244   :  { %820 = vmatmul.mubr.f32.vlgmr.msra.gmra.mrb[4].mxu1 %v534_v17 }
 0x317   :  { %v624_v18 = vpop.f32.mrb[4].mxu1 }
 0x318   :  { %v625_v19 = vadd.f32 %v647_v59, %v624_v18  ;;  %v821_v20 = vpop.f32.mrb[5].mxu1 }
 0x31a   :  { %628 = vst [vmem:[#allocation10] sm:$0xff] %v625_v19 }
 0x31b   :  { %1109 = shalt.err (!%p1106_p8)
}
 0x31c   :  { %s1110_s11 = scalar_lea.hbm %s1278_s7, 128 }
 0x31d   :  { %p1111_p9 = scmp.ne.s32.totalorder %s1278_s7, %s1110_s11  ;;  %p1114_p10 = scmp.lt.u32.totalorder %s1110_s11, %s1278_s7 }
 0x31f   :  { %p1116_p11 = pnand %p1114_p10, %p1111_p9 }
 0x321   :  { %1119 = shalt.err (!%p1116_p11)
}
 0x322   :  { %638 = dma.vmem_to_hbm [thread:$0]  %s636_s8, 128, %s1278_s7, [#allocation4]  }
 0x323   :  { %1126 = dma.done.wait [#allocation4], 128  }
 0x324   :  { %1127 = vsyncadd [#allocation4], 4294967168 }
 0x325   :  { %642 = vsyncpa [#allocation3], 1 }
 0x326   :  { %643 = vsyncpa [#allocation6], 1 }
 0x327   :  { %644 = vsyncpa [#allocation9], 1 }
 0x328   :  { %645 = vsyncpa [#allocation4], 1 }

</bundles_post_ra>
